<compile_context>
chip_gen: v7x
topology: tpu7x:2x2x1
jax: 0.10.0
libtpu: 0.0.40
codegen_flags: <defaults>
</compile_context>

<pallas_src>
import functools

import jax
import jax.numpy as jnp
from jax.experimental import pallas as pl
from jax.experimental.pallas import tpu as pltpu


def _sigmoid(x):
    # explicit exp-based sigmoid: guaranteed Mosaic lowering, EUP exp.
    return 1.0 / (1.0 + jnp.exp(-x))


# ----------------------------- fused kernel ---------------------------------

def _attn_decoder_step_kernel(
    emb_ref,      # (B, H)   f32  embedded word (dropout treated as identity)
    h_ref,        # (B, H)   f32  last_hidden[-1]
    enc_ref,      # (B, L, H) f32 encoder_outputs
    w_attn_ref,   # (H, H)   bf16 Attn('general') Linear weight, PyTorch (out,in)
    b_attn_ref,   # (1, H)   f32
    w_gi_e_ref,   # (H, H)   bf16 gru_input block acting on word_embedded
    w_gi_c_ref,   # (H, H)   bf16 gru_input block acting on context
    b_gi_ref,     # (1, H)   f32
    w_ih_ref,     # (H, 3H)  bf16 GRU W_ih^T, gate order r|z|n
    b_ih_ref,     # (1, 3H)  f32
    w_hh_ref,     # (H, 3H)  bf16 GRU W_hh^T
    b_hh_ref,     # (1, 3H)  f32
    w_out_h_ref,  # (H, V)   bf16 out-Linear block acting on gru output
    w_out_c_ref,  # (H, V)   bf16 out-Linear block acting on context
    b_out_ref,    # (1, V)   f32
    logp_ref,     # (B, V)   f32  out: log-probs
    hid_ref,      # (B, H)   f32  out: new hidden state
    attw_ref,     # (B, L, 1) f32 out: attention weights
    *, hidden_size,
):
    H = hidden_size
    f32, bf16 = jnp.float32, jnp.bfloat16

    emb = emb_ref[...]                                               # (B, H)
    h = h_ref[...]                                                   # (B, H)
    enc = enc_ref[...]                                               # (B, L, H)

    # --- Attn('general'): energy[b,i] = h_b . (W_attn enc_bi + b_attn)
    #     = (h_b W_attn) . enc_bi + h_b . b_attn  (only h goes through the MXU)
    hp = jnp.dot(h.astype(bf16), w_attn_ref[...],
                 preferred_element_type=f32)                         # (B, H)
    hbias = (h * b_attn_ref[...])[:, None, :]                        # (B, 1, H)
    energies = jnp.sum(enc * hp[:, None, :] + hbias,
                       axis=-1, keepdims=True)                       # (B, L, 1)

    # softmax over max_len (F.softmax legacy default dim=1 on 2-D energies)
    m = jnp.max(energies, axis=1, keepdims=True)                     # (B, 1, 1)
    e = jnp.exp(energies - m)
    attw = e / jnp.sum(e, axis=1, keepdims=True)                     # (B, L, 1)
    attw_ref[...] = attw

    # --- context = attn_weights.bmm(encoder_outputs)
    context = jnp.sum(attw * enc, axis=1)                            # (B, H)

    # --- rnn_input = relu(gru_input(cat(word_embedded, context)))
    x = jnp.dot(emb.astype(bf16), w_gi_e_ref[...],
                preferred_element_type=f32)
    x = x + jnp.dot(context.astype(bf16), w_gi_c_ref[...],
                    preferred_element_type=f32)
    x = jnp.maximum(x + b_gi_ref[...], 0.0)                          # (B, H)

    # --- single-layer GRU cell, one time step (batch_first)
    gi = jnp.dot(x.astype(bf16), w_ih_ref[...],
                 preferred_element_type=f32) + b_ih_ref[...]         # (B, 3H)
    gh = jnp.dot(h.astype(bf16), w_hh_ref[...],
                 preferred_element_type=f32) + b_hh_ref[...]         # (B, 3H)
    r = _sigmoid(gi[:, 0:H] + gh[:, 0:H])
    z = _sigmoid(gi[:, H:2 * H] + gh[:, H:2 * H])
    n = jnp.tanh(gi[:, 2 * H:3 * H] + r * gh[:, 2 * H:3 * H])
    h_new = (1.0 - z) * n + z * h                                    # (B, H)
    hid_ref[...] = h_new

    # --- output = log_softmax(out(cat(gru_output, context)))
    logits = jnp.dot(h_new.astype(bf16), w_out_h_ref[...],
                     preferred_element_type=f32)
    logits = logits + jnp.dot(context.astype(bf16), w_out_c_ref[...],
                              preferred_element_type=f32)
    logits = logits + b_out_ref[...]                                 # (B, V)
    # TODO(synk): F.log_softmax is called without `dim` on a 3-D tensor (legacy
    # default dim=0, over batch); we apply the evidently intended vocab-dim
    # log-softmax.
    lm = jnp.max(logits, axis=-1, keepdims=True)
    sh = logits - lm
    logp_ref[...] = sh - jnp.log(jnp.sum(jnp.exp(sh), axis=-1, keepdims=True))


# ------------------------------- wrapper -------------------------------------

def attn_decoder_forward(params, word_input, last_hidden, encoder_outputs):
    """One AttnDecoder step.

    word_input:      (B,) int32 token ids
    last_hidden:     (1, B, H)   (n_layers = 1, the module default)
    encoder_outputs: (B, L, H)
    returns (log_probs (B,1,V), hidden (1,B,H), attn_weights (B,1,L))
    """
    B, L, H = encoder_outputs.shape
    V = params["b_out"].shape[-1]

    # Embedding lookup is a B-row (~1 KiB) gather; doing it in-kernel would
    # force the whole (V, H) table through VMEM, so it stays as wrapper glue.
    emb = jnp.take(params["emb"], word_input, axis=0)                # (B, H)
    # TODO(synk): nn.Dropout(p=0.1) treated as identity (eval semantics);
    # training-mode dropout would need pltpu.prng_random_bits masking.
    # TODO(synk): n_layers is fixed at 1 (the module default); a stacked GRU
    # with inter-layer dropout is not implemented.
    h_top = last_hidden[-1]                                          # (B, H)

    inputs = (
        emb, h_top, encoder_outputs,
        params["w_attn"], params["b_attn"],
        params["w_gi_e"], params["w_gi_c"], params["b_gi"],
        params["w_ih"], params["b_ih"], params["w_hh"], params["b_hh"],
        params["w_out_h"], params["w_out_c"], params["b_out"],
    )
    vmem = pl.BlockSpec(memory_space=pltpu.MemorySpace.VMEM)
    logp, h_new, attw = pl.pallas_call(
        functools.partial(_attn_decoder_step_kernel, hidden_size=H),
        out_shape=(
            jax.ShapeDtypeStruct((B, V), jnp.float32),
            jax.ShapeDtypeStruct((B, H), jnp.float32),
            jax.ShapeDtypeStruct((B, L, 1), jnp.float32),
        ),
        in_specs=[vmem] * len(inputs),
        out_specs=(vmem, vmem, vmem),
        # no grid, no vmem_limit override: whole problem (~1.3 MiB) is one
        # VMEM-resident block; default scoped VMEM limit is plenty on v5e/v6e/v7x.
    )(*inputs)

    # PyTorch: output.squeeze(0) is a no-op for B > 1; shapes below match the
    # reference module for B >= 2, n_layers = 1.
    return (logp.reshape(B, 1, V),
            h_new.reshape(1, B, H),
            attw.reshape(B, 1, L))


# ------------------------------- params --------------------------------------

def init_params(key, hidden_size, output_size):
    H, V = hidden_size, output_size
    ks = jax.random.split(key, 13)
    bf16 = jnp.bfloat16

    def lin(k, fan_in, shape, dtype=jnp.float32):
        bound = fan_in ** -0.5
        return jax.random.uniform(k, shape, jnp.float32, -bound, bound).astype(dtype)

    return {
        # nn.Embedding default init N(0,1); table stays f32 (only B rows are used).
        "emb": jax.random.normal(ks[0], (V, H), jnp.float32),
        # Attn('general').attn: Linear(H, H), PyTorch (out, in) layout.
        "w_attn": lin(ks[1], H, (H, H), bf16),
        "b_attn": lin(ks[2], H, (1, H)),
        # gru_input: Linear(2H, H), stored transposed & split (embedded | context).
        "w_gi_e": lin(ks[3], 2 * H, (H, H), bf16),
        "w_gi_c": lin(ks[4], 2 * H, (H, H), bf16),
        "b_gi": lin(ks[5], 2 * H, (1, H)),
        # GRU(H, H, num_layers=1): weights stored transposed to (H, 3H), gates r|z|n.
        "w_ih": lin(ks[6], H, (H, 3 * H), bf16),
        "b_ih": lin(ks[7], H, (1, 3 * H)),
        "w_hh": lin(ks[8], H, (H, 3 * H), bf16),
        "b_hh": lin(ks[9], H, (1, 3 * H)),
        # out: Linear(2H, V), stored transposed & split (gru output | context).
        "w_out_h": lin(ks[10], 2 * H, (H, V), bf16),
        "w_out_c": lin(ks[11], 2 * H, (H, V), bf16),
        "b_out": lin(ks[12], 2 * H, (1, V)),
    }


# --------------------------- pure-JAX reference -------------------------------

def reference_forward(params, word_input, last_hidden, encoder_outputs):
    """Pure-JAX reference following the PyTorch op order (eval-mode dropout)."""
    p = params
    f32, bf16 = jnp.float32, jnp.bfloat16
    B, L, H = encoder_outputs.shape

    emb = jnp.take(p["emb"], word_input, axis=0)                     # (B, H)
    h = last_hidden[-1]                                              # (B, H)

    # Attn('general'): energy[b,i] = h_b . attn(enc_bi)
    proj = jnp.dot(encoder_outputs.astype(bf16).reshape(B * L, H),
                   p["w_attn"].T,
                   preferred_element_type=f32).reshape(B, L, H) + p["b_attn"]
    energies = jnp.sum(proj * h[:, None, :], axis=-1)                # (B, L)
    attw = jax.nn.softmax(energies, axis=-1)
    context = jnp.einsum("bl,blh->bh", attw, encoder_outputs)        # (B, H)

    w_gi = jnp.concatenate([p["w_gi_e"], p["w_gi_c"]], axis=0)       # (2H, H)
    rnn_in = jnp.maximum(
        jnp.dot(jnp.concatenate([emb, context], axis=-1).astype(bf16),
                w_gi, preferred_element_type=f32) + p["b_gi"], 0.0)

    gi = jnp.dot(rnn_in.astype(bf16), p["w_ih"],
                 preferred_element_type=f32) + p["b_ih"]
    gh = jnp.dot(h.astype(bf16), p["w_hh"],
                 preferred_element_type=f32) + p["b_hh"]
    r = _sigmoid(gi[:, :H] + gh[:, :H])
    z = _sigmoid(gi[:, H:2 * H] + gh[:, H:2 * H])
    n = jnp.tanh(gi[:, 2 * H:] + r * gh[:, 2 * H:])
    h_new = (1.0 - z) * n + z * h

    w_out = jnp.concatenate([p["w_out_h"], p["w_out_c"]], axis=0)    # (2H, V)
    logits = jnp.dot(jnp.concatenate([h_new, context], axis=-1).astype(bf16),
                     w_out, preferred_element_type=f32) + p["b_out"]
    logp = jax.nn.log_softmax(logits, axis=-1)
    return (logp.reshape(B, 1, -1), h_new.reshape(1, B, H),
            attw.reshape(B, 1, L))


# --------------------------------- main ---------------------------------------

if __name__ == "__main__":
    B, L, H, V = 2, 8, 128, 256     # batch, max_length, hidden_size, output_size
    key = jax.random.PRNGKey(0)
    kp, kw, kh, ke = jax.random.split(key, 4)
    params = init_params(kp, H, V)
    word_input = jax.random.randint(kw, (B,), 0, V, dtype=jnp.int32)
    last_hidden = jax.random.normal(kh, (1, B, H), jnp.float32)
    encoder_outputs = jax.random.normal(ke, (B, L, H), jnp.float32)

    fwd = jax.jit(functools.partial(attn_decoder_forward, params))
    out, hidden, attw = jax.block_until_ready(
        fwd(word_input, last_hidden, encoder_outputs))

    assert out.shape == (B, 1, V), out.shape
    assert hidden.shape == (1, B, H), hidden.shape
    assert attw.shape == (B, 1, L), attw.shape
    assert jnp.all(jnp.isfinite(out)) and jnp.all(jnp.isfinite(hidden))
    # softmax invariants
    assert jnp.allclose(attw.sum(axis=-1), 1.0, atol=1e-3)
    assert jnp.allclose(jnp.exp(out).sum(axis=-1), 1.0, atol=1e-3)

    # pure-JAX reference check (PyTorch-literal op order, same bf16 weights).
    r_out, r_hid, r_attw = reference_forward(params, word_input, last_hidden,
                                             encoder_outputs)
    assert jnp.allclose(out, r_out, atol=5e-2), float(jnp.max(jnp.abs(out - r_out)))
    assert jnp.allclose(hidden, r_hid, atol=5e-2), float(jnp.max(jnp.abs(hidden - r_hid)))
    assert jnp.allclose(attw, r_attw, atol=5e-2), float(jnp.max(jnp.abs(attw - r_attw)))

    print("KERNEL_OK")
</pallas_src>

<mosaic_0001>
module attributes {stable_mosaic.version = 11 : i64} {
  func.func @_attn_decoder_step_kernel(%arg0: memref<2x128xf32, #tpu.memory_space<vmem>>, %arg1: memref<2x128xf32, #tpu.memory_space<vmem>>, %arg2: memref<2x8x128xf32, #tpu.memory_space<vmem>>, %arg3: memref<128x128xbf16, #tpu.memory_space<vmem>>, %arg4: memref<1x128xf32, #tpu.memory_space<vmem>>, %arg5: memref<128x128xbf16, #tpu.memory_space<vmem>>, %arg6: memref<128x128xbf16, #tpu.memory_space<vmem>>, %arg7: memref<1x128xf32, #tpu.memory_space<vmem>>, %arg8: memref<128x384xbf16, #tpu.memory_space<vmem>>, %arg9: memref<1x384xf32, #tpu.memory_space<vmem>>, %arg10: memref<128x384xbf16, #tpu.memory_space<vmem>>, %arg11: memref<1x384xf32, #tpu.memory_space<vmem>>, %arg12: memref<128x256xbf16, #tpu.memory_space<vmem>>, %arg13: memref<128x256xbf16, #tpu.memory_space<vmem>>, %arg14: memref<1x256xf32, #tpu.memory_space<vmem>>, %arg15: memref<2x256xf32, #tpu.memory_space<vmem>>, %arg16: memref<2x128xf32, #tpu.memory_space<vmem>>, %arg17: memref<2x8x1xf32, #tpu.memory_space<vmem>>) attributes {dimension_semantics = [], scalar_prefetch = 0 : i64, scratch_operands = 0 : i64, tpu.core_type = #tpu.core_type<tc>} {
    %c0 = arith.constant 0 : index
    %c0_0 = arith.constant 0 : index
    %0 = vector.load %arg0[%c0, %c0_0] : memref<2x128xf32, #tpu.memory_space<vmem>>, vector<2x128xf32>
    %c0_1 = arith.constant 0 : index
    %c0_2 = arith.constant 0 : index
    %1 = vector.load %arg1[%c0_1, %c0_2] : memref<2x128xf32, #tpu.memory_space<vmem>>, vector<2x128xf32>
    %c0_3 = arith.constant 0 : index
    %c0_4 = arith.constant 0 : index
    %c0_5 = arith.constant 0 : index
    %2 = vector.load %arg2[%c0_3, %c0_4, %c0_5] : memref<2x8x128xf32, #tpu.memory_space<vmem>>, vector<2x8x128xf32>
    %3 = arith.truncf %1 : vector<2x128xf32> to vector<2x128xbf16>
    %c0_6 = arith.constant 0 : index
    %c0_7 = arith.constant 0 : index
    %4 = vector.load %arg3[%c0_6, %c0_7] : memref<128x128xbf16, #tpu.memory_space<vmem>>, vector<128x128xbf16>
    %cst = arith.constant dense<0.000000e+00> : vector<2x128xf32>
    %5 = tpu.matmul %3, %4, %cst {dimension_numbers = #tpu.dot_dimension_numbers<[1], [0], [0], [1], [0, 0, 1, 1], [], []>} : vector<2x128xbf16>, vector<128x128xbf16>, vector<2x128xf32> -> vector<2x128xf32>
    %c0_8 = arith.constant 0 : index
    %c0_9 = arith.constant 0 : index
    %6 = vector.load %arg4[%c0_8, %c0_9] : memref<1x128xf32, #tpu.memory_space<vmem>>, vector<1x128xf32>
    %7 = vector.broadcast %6 : vector<1x128xf32> to vector<2x128xf32>
    %8 = arith.mulf %1, %7 : vector<2x128xf32>
    %9 = vector.shape_cast %8 : vector<2x128xf32> to vector<2x1x128xf32>
    %10 = vector.shape_cast %5 : vector<2x128xf32> to vector<2x1x128xf32>
    %11 = vector.broadcast %10 : vector<2x1x128xf32> to vector<2x8x128xf32>
    %12 = arith.mulf %2, %11 : vector<2x8x128xf32>
    %13 = vector.broadcast %9 : vector<2x1x128xf32> to vector<2x8x128xf32>
    %14 = arith.addf %12, %13 : vector<2x8x128xf32>
    %cst_10 = arith.constant dense<0.000000e+00> : vector<2x8xf32>
    %15 = vector.multi_reduction <add>, %14, %cst_10 [2] : vector<2x8x128xf32> to vector<2x8xf32>
    %16 = vector.shape_cast %15 : vector<2x8xf32> to vector<2x8x1xf32>
    %cst_11 = arith.constant dense<0xFF800000> : vector<2x1xf32>
    %17 = vector.multi_reduction <maximumf>, %16, %cst_11 [1] : vector<2x8x1xf32> to vector<2x1xf32>
    %18 = vector.shape_cast %17 : vector<2x1xf32> to vector<2x1x1xf32>
    %19 = vector.broadcast %18 : vector<2x1x1xf32> to vector<2x8x1xf32>
    %20 = arith.subf %16, %19 : vector<2x8x1xf32>
    %21 = math.exp %20 : vector<2x8x1xf32>
    %cst_12 = arith.constant dense<0.000000e+00> : vector<2x1xf32>
    %22 = vector.multi_reduction <add>, %21, %cst_12 [1] : vector<2x8x1xf32> to vector<2x1xf32>
    %23 = vector.shape_cast %22 : vector<2x1xf32> to vector<2x1x1xf32>
    %24 = vector.broadcast %23 : vector<2x1x1xf32> to vector<2x8x1xf32>
    %25 = arith.divf %21, %24 : vector<2x8x1xf32>
    %c0_13 = arith.constant 0 : index
    %c0_14 = arith.constant 0 : index
    %c0_15 = arith.constant 0 : index
    %26 = vector.load %arg17[%c0_13, %c0_14, %c0_15] : memref<2x8x1xf32, #tpu.memory_space<vmem>>, vector<2x8x1xf32>
    tpu.vector_store %arg17[%c0_13, %c0_14, %c0_15], %25 {strides = array<i32>} : memref<2x8x1xf32, #tpu.memory_space<vmem>>, vector<2x8x1xf32>,
    %27 = vector.broadcast %25 : vector<2x8x1xf32> to vector<2x8x128xf32>
    %28 = arith.mulf %27, %2 : vector<2x8x128xf32>
    %cst_16 = arith.constant dense<0.000000e+00> : vector<2x128xf32>
    %29 = vector.multi_reduction <add>, %28, %cst_16 [1] : vector<2x8x128xf32> to vector<2x128xf32>
    %30 = arith.truncf %0 : vector<2x128xf32> to vector<2x128xbf16>
    %c0_17 = arith.constant 0 : index
    %c0_18 = arith.constant 0 : index
    %31 = vector.load %arg5[%c0_17, %c0_18] : memref<128x128xbf16, #tpu.memory_space<vmem>>, vector<128x128xbf16>
    %cst_19 = arith.constant dense<0.000000e+00> : vector<2x128xf32>
    %32 = tpu.matmul %30, %31, %cst_19 {dimension_numbers = #tpu.dot_dimension_numbers<[1], [0], [0], [1], [0, 0, 1, 1], [], []>} : vector<2x128xbf16>, vector<128x128xbf16>, vector<2x128xf32> -> vector<2x128xf32>
    %33 = arith.truncf %29 : vector<2x128xf32> to vector<2x128xbf16>
    %c0_20 = arith.constant 0 : index
    %c0_21 = arith.constant 0 : index
    %34 = vector.load %arg6[%c0_20, %c0_21] : memref<128x128xbf16, #tpu.memory_space<vmem>>, vector<128x128xbf16>
    %cst_22 = arith.constant dense<0.000000e+00> : vector<2x128xf32>
    %35 = tpu.matmul %33, %34, %cst_22 {dimension_numbers = #tpu.dot_dimension_numbers<[1], [0], [0], [1], [0, 0, 1, 1], [], []>} : vector<2x128xbf16>, vector<128x128xbf16>, vector<2x128xf32> -> vector<2x128xf32>
    %36 = arith.addf %32, %35 : vector<2x128xf32>
    %c0_23 = arith.constant 0 : index
    %c0_24 = arith.constant 0 : index
    %37 = vector.load %arg7[%c0_23, %c0_24] : memref<1x128xf32, #tpu.memory_space<vmem>>, vector<1x128xf32>
    %38 = vector.broadcast %37 : vector<1x128xf32> to vector<2x128xf32>
    %39 = arith.addf %36, %38 : vector<2x128xf32>
    %cst_25 = arith.constant 0.000000e+00 : f32
    %40 = vector.broadcast %cst_25 : f32 to vector<2x128xf32>
    %41 = arith.maximumf %39, %40 : vector<2x128xf32>
    %42 = arith.truncf %41 : vector<2x128xf32> to vector<2x128xbf16>
    %c0_26 = arith.constant 0 : index
    %c0_27 = arith.constant 0 : index
    %43 = vector.load %arg8[%c0_26, %c0_27] : memref<128x384xbf16, #tpu.memory_space<vmem>>, vector<128x384xbf16>
    %cst_28 = arith.constant dense<0.000000e+00> : vector<2x384xf32>
    %44 = tpu.matmul %42, %43, %cst_28 {dimension_numbers = #tpu.dot_dimension_numbers<[1], [0], [0], [1], [0, 0, 1, 1], [], []>} : vector<2x128xbf16>, vector<128x384xbf16>, vector<2x384xf32> -> vector<2x384xf32>
    %c0_29 = arith.constant 0 : index
    %c0_30 = arith.constant 0 : index
    %45 = vector.load %arg9[%c0_29, %c0_30] : memref<1x384xf32, #tpu.memory_space<vmem>>, vector<1x384xf32>
    %46 = vector.broadcast %45 : vector<1x384xf32> to vector<2x384xf32>
    %47 = arith.addf %44, %46 : vector<2x384xf32>
    %48 = arith.truncf %1 : vector<2x128xf32> to vector<2x128xbf16>
    %c0_31 = arith.constant 0 : index
    %c0_32 = arith.constant 0 : index
    %49 = vector.load %arg10[%c0_31, %c0_32] : memref<128x384xbf16, #tpu.memory_space<vmem>>, vector<128x384xbf16>
    %cst_33 = arith.constant dense<0.000000e+00> : vector<2x384xf32>
    %50 = tpu.matmul %48, %49, %cst_33 {dimension_numbers = #tpu.dot_dimension_numbers<[1], [0], [0], [1], [0, 0, 1, 1], [], []>} : vector<2x128xbf16>, vector<128x384xbf16>, vector<2x384xf32> -> vector<2x384xf32>
    %c0_34 = arith.constant 0 : index
    %c0_35 = arith.constant 0 : index
    %51 = vector.load %arg11[%c0_34, %c0_35] : memref<1x384xf32, #tpu.memory_space<vmem>>, vector<1x384xf32>
    %52 = vector.broadcast %51 : vector<1x384xf32> to vector<2x384xf32>
    %53 = arith.addf %50, %52 : vector<2x384xf32>
    %54 = vector.extract_strided_slice %47 {offsets = [0, 0], sizes = [2, 128], strides = [1, 1]} : vector<2x384xf32> to vector<2x128xf32>
    %55 = vector.extract_strided_slice %53 {offsets = [0, 0], sizes = [2, 128], strides = [1, 1]} : vector<2x384xf32> to vector<2x128xf32>
    %56 = arith.addf %54, %55 : vector<2x128xf32>
    %cst_36 = arith.constant 0.000000e+00 : f32
    %57 = vector.broadcast %cst_36 : f32 to vector<2x128xf32>
    %58 = arith.subf %57, %56 : vector<2x128xf32>
    %59 = math.exp %58 : vector<2x128xf32>
    %cst_37 = arith.constant 1.000000e+00 : f32
    %60 = vector.broadcast %cst_37 : f32 to vector<2x128xf32>
    %61 = arith.addf %60, %59 : vector<2x128xf32>
    %cst_38 = arith.constant 1.000000e+00 : f32
    %62 = vector.broadcast %cst_38 : f32 to vector<2x128xf32>
    %63 = arith.divf %62, %61 : vector<2x128xf32>
    %64 = vector.extract_strided_slice %47 {offsets = [0, 128], sizes = [2, 128], strides = [1, 1]} : vector<2x384xf32> to vector<2x128xf32>
    %65 = vector.extract_strided_slice %53 {offsets = [0, 128], sizes = [2, 128], strides = [1, 1]} : vector<2x384xf32> to vector<2x128xf32>
    %66 = arith.addf %64, %65 : vector<2x128xf32>
    %cst_39 = arith.constant 0.000000e+00 : f32
    %67 = vector.broadcast %cst_39 : f32 to vector<2x128xf32>
    %68 = arith.subf %67, %66 : vector<2x128xf32>
    %69 = math.exp %68 : vector<2x128xf32>
    %cst_40 = arith.constant 1.000000e+00 : f32
    %70 = vector.broadcast %cst_40 : f32 to vector<2x128xf32>
    %71 = arith.addf %70, %69 : vector<2x128xf32>
    %cst_41 = arith.constant 1.000000e+00 : f32
    %72 = vector.broadcast %cst_41 : f32 to vector<2x128xf32>
    %73 = arith.divf %72, %71 : vector<2x128xf32>
    %74 = vector.extract_strided_slice %47 {offsets = [0, 256], sizes = [2, 128], strides = [1, 1]} : vector<2x384xf32> to vector<2x128xf32>
    %75 = vector.extract_strided_slice %53 {offsets = [0, 256], sizes = [2, 128], strides = [1, 1]} : vector<2x384xf32> to vector<2x128xf32>
    %76 = arith.mulf %63, %75 : vector<2x128xf32>
    %77 = arith.addf %74, %76 : vector<2x128xf32>
    %78 = math.tanh %77 : vector<2x128xf32>
    %cst_42 = arith.constant 1.000000e+00 : f32
    %79 = vector.broadcast %cst_42 : f32 to vector<2x128xf32>
    %80 = arith.subf %79, %73 : vector<2x128xf32>
    %81 = arith.mulf %80, %78 : vector<2x128xf32>
    %82 = arith.mulf %73, %1 : vector<2x128xf32>
    %83 = arith.addf %81, %82 : vector<2x128xf32>
    %c0_43 = arith.constant 0 : index
    %c0_44 = arith.constant 0 : index
    %84 = vector.load %arg16[%c0_43, %c0_44] : memref<2x128xf32, #tpu.memory_space<vmem>>, vector<2x128xf32>
    tpu.vector_store %arg16[%c0_43, %c0_44], %83 {strides = array<i32>} : memref<2x128xf32, #tpu.memory_space<vmem>>, vector<2x128xf32>,
    %85 = arith.truncf %83 : vector<2x128xf32> to vector<2x128xbf16>
    %c0_45 = arith.constant 0 : index
    %c0_46 = arith.constant 0 : index
    %86 = vector.load %arg12[%c0_45, %c0_46] : memref<128x256xbf16, #tpu.memory_space<vmem>>, vector<128x256xbf16>
    %cst_47 = arith.constant dense<0.000000e+00> : vector<2x256xf32>
    %87 = tpu.matmul %85, %86, %cst_47 {dimension_numbers = #tpu.dot_dimension_numbers<[1], [0], [0], [1], [0, 0, 1, 1], [], []>} : vector<2x128xbf16>, vector<128x256xbf16>, vector<2x256xf32> -> vector<2x256xf32>
    %88 = arith.truncf %29 : vector<2x128xf32> to vector<2x128xbf16>
    %c0_48 = arith.constant 0 : index
    %c0_49 = arith.constant 0 : index
    %89 = vector.load %arg13[%c0_48, %c0_49] : memref<128x256xbf16, #tpu.memory_space<vmem>>, vector<128x256xbf16>
    %cst_50 = arith.constant dense<0.000000e+00> : vector<2x256xf32>
    %90 = tpu.matmul %88, %89, %cst_50 {dimension_numbers = #tpu.dot_dimension_numbers<[1], [0], [0], [1], [0, 0, 1, 1], [], []>} : vector<2x128xbf16>, vector<128x256xbf16>, vector<2x256xf32> -> vector<2x256xf32>
    %91 = arith.addf %87, %90 : vector<2x256xf32>
    %c0_51 = arith.constant 0 : index
    %c0_52 = arith.constant 0 : index
    %92 = vector.load %arg14[%c0_51, %c0_52] : memref<1x256xf32, #tpu.memory_space<vmem>>, vector<1x256xf32>
    %93 = vector.broadcast %92 : vector<1x256xf32> to vector<2x256xf32>
    %94 = arith.addf %91, %93 : vector<2x256xf32>
    %cst_53 = arith.constant dense<0xFF800000> : vector<2xf32>
    %95 = vector.multi_reduction <maximumf>, %94, %cst_53 [1] : vector<2x256xf32> to vector<2xf32>
    %96 = vector.shape_cast %95 : vector<2xf32> to vector<2x1xf32>
    %97 = vector.broadcast %96 : vector<2x1xf32> to vector<2x256xf32>
    %98 = arith.subf %94, %97 : vector<2x256xf32>
    %99 = math.exp %98 : vector<2x256xf32>
    %cst_54 = arith.constant dense<0.000000e+00> : vector<2xf32>
    %100 = vector.multi_reduction <add>, %99, %cst_54 [1] : vector<2x256xf32> to vector<2xf32>
    %101 = vector.shape_cast %100 : vector<2xf32> to vector<2x1xf32>
    %102 = math.log %101 : vector<2x1xf32>
    %103 = vector.broadcast %102 : vector<2x1xf32> to vector<2x256xf32>
    %104 = arith.subf %98, %103 : vector<2x256xf32>
    %c0_55 = arith.constant 0 : index
    %c0_56 = arith.constant 0 : index
    %105 = vector.load %arg15[%c0_55, %c0_56] : memref<2x256xf32, #tpu.memory_space<vmem>>, vector<2x256xf32>
    tpu.vector_store %arg15[%c0_55, %c0_56], %104 {strides = array<i32>} : memref<2x256xf32, #tpu.memory_space<vmem>>, vector<2x256xf32>,
    return
  }
}

</mosaic_0001>

<bundles_post_ra>
// kernel: attn_decoder_forward.1
= control target key start
LH: loop header
LB: loop body
LE: loop exit
PB: predicated region body
PF: predicated region fallthrough
CT: control target
= control target key end

     0   :  { %s2413_s0 = inlined_call_operand.vmem [shape: f32[2,128], index: 0, kind: input, shape index: {}]   ;;  %s2414_s1 = inlined_call_operand.vmem [shape: f32[2,128], index: 1, kind: input, shape index: {}]   ;;  %s2415_s2 = inlined_call_operand.vmem [shape: f32[2,8,128], index: 2, kind: input, shape index: {}]   ;;  %s2416_s3 = inlined_call_operand.vmem [shape: bf16[128,128], index: 3, kind: input, shape index: {}]   ;;  %s2417_s4 = inlined_call_operand.vmem [shape: f32[1,128], index: 4, kind: input, shape index: {}]   ;;  %s2418_s5 = inlined_call_operand.vmem [shape: bf16[128,128], index: 5, kind: input, shape index: {}]   ;;  %s2419_s6 = inlined_call_operand.vmem [shape: bf16[128,128], index: 6, kind: input, shape index: {}]   ;;  %s2420_s7 = inlined_call_operand.vmem [shape: f32[1,128], index: 7, kind: input, shape index: {}]   ;;  %s2421_s8 = inlined_call_operand.vmem [shape: bf16[128,384], index: 8, kind: input, shape index: {}]   ;;  %s2422_s9 = inlined_call_operand.vmem [shape: f32[1,384], index: 9, kind: input, shape index: {}]   ;;  %s2423_s10 = inlined_call_operand.vmem [shape: bf16[128,384], index: 10, kind: input, shape index: {}]   ;;  %s2424_s11 = inlined_call_operand.vmem [shape: f32[1,384], index: 11, kind: input, shape index: {}]   ;;  %s2425_s12 = inlined_call_operand.vmem [shape: bf16[128,256], index: 12, kind: input, shape index: {}]   ;;  %s2426_s13 = inlined_call_operand.vmem [shape: bf16[128,256], index: 13, kind: input, shape index: {}]   ;;  %s2427_s14 = inlined_call_operand.vmem [shape: f32[1,256], index: 14, kind: input, shape index: {}]   ;;  %s2428_s15 = inlined_call_operand.vmem [shape: f32[2,256], index: 15, kind: output, shape index: {0}]   ;;  %s2429_s16 = inlined_call_operand.hbm [shape: f32[2,128], index: 16, kind: output, shape index: {1}]   ;;  %s2430_s17 = inlined_call_operand.vmem [shape: f32[2,8,1], index: 17, kind: output, shape index: {2}]  }
   0x1   :  { %2431 = sst [smem:[#allocation5_spill]] %s2413_s0 }
   0x2   :  { %2432 = sst [smem:[#allocation6_spill]] %s2414_s1 }
   0x3   :  { %v1673_v0 = vld [vmem:[%s2416_s3] sm:$0xff]   ;;  %v1857_v1 = vmov 0.0   ;;  %v1674_v2 = vld [vmem:[%s2416_s3 + $0x8] sm:$0xff]   ;;  %vm1858_vm0 = vmmov 0   ;;  %v1675_v3 = vld [vmem:[%s2416_s3 + $0x10] sm:$0xff]   ;;  %s2433_s27 = sld [smem:[#allocation6_spill]] }
   0x4   :  { %1560 = vmatprep.subr.bf16.mxu0 %v1857_v1  ;;  %1580 = vmatprep.subr.bf16.mxu1 %v1857_v1  ;;  %v1676_v4 = vld [vmem:[%s2416_s3 + $0x18] sm:$0xff]   ;;  %v1677_v5 = vld [vmem:[%s2416_s3 + $0x20] sm:$0xff]   ;;  %v1678_v6 = vld [vmem:[%s2416_s3 + $0x28] sm:$0xff]  }
   0x5   :  { %1561 = vmatpush3.bf16.msra.mxu0 %v1673_v0  ;;  %1576 = vmatprep.mubr.msk.bf16.mxu0 %vm1858_vm0, %v1857_v1  ;;  %v1679_v7 = vld [vmem:[%s2416_s3 + $0x30] sm:$0xff]   ;;  %v1680_v8 = vld [vmem:[%s2416_s3 + $0x38] sm:$0xff]  }
   0x6   :  { %1562 = vmatprep.subr.bf16.mxu0 %v1857_v1  ;;  %1596 = vmatprep.mubr.msk.bf16.mxu1 %vm1858_vm0, %v1857_v1 }
   0x9   :  { %1563 = vmatpush3.bf16.msra.mxu0 %v1674_v2  ;;  %v1991_v9 = vld [vmem:[%s2433_s27] sm:$0x3] }
   0xa   :  { %1564 = vmatprep.subr.bf16.mxu0 %v1857_v1  ;;  %v1996_v10 = vpack.c.bf16 %v1991_v9, %v1991_v9 }
   0xd   :  { %1565 = vmatpush3.bf16.msra.mxu0 %v1675_v3 }
   0xe   :  { %1566 = vmatprep.subr.bf16.mxu0 %v1857_v1 }
  0x11   :  { %1567 = vmatpush3.bf16.msra.mxu0 %v1676_v4 }
  0x12   :  { %1568 = vmatprep.subr.bf16.mxu0 %v1857_v1 }
  0x15   :  { %1569 = vmatpush3.bf16.msra.mxu0 %v1677_v5 }
  0x16   :  { %1570 = vmatprep.subr.bf16.mxu0 %v1857_v1 }
  0x19   :  { %1571 = vmatpush3.bf16.msra.mxu0 %v1678_v6 }
  0x1a   :  { %1572 = vmatprep.subr.bf16.mxu0 %v1857_v1 }
  0x1d   :  { %1573 = vmatpush3.bf16.msra.mxu0 %v1679_v7 }
  0x1e   :  { %1574 = vmatprep.subr.bf16.mxu0 %v1857_v1 }
  0x21   :  { %1575 = vmatpush3.bf16.msra.mxu0 %v1680_v8 }
  0x22   :  { %1600 = vmatprep.subr.bf16.mxu0 %v1857_v1 }
  0x24   :  { %1577 = vmatmul.mubr.bf16.vlgmr.msra.gmra.mrb[0].mxu0 %v1996_v10 }
  0x25   :  { %1616 = vmatprep.mubr.msk.bf16.mxu0 %vm1858_vm0, %v1857_v1 }
  0x26   :  { %23 = vsyncpa [#allocation3], 0  ;;  %v1859_v11 = vmov 1966171168   ;;  %v176_v13 = vlaneseq  ;;  %v1416_v14 = vld [vmem:[%s2417_s4] ss:$0 sm:$0xff] }
  0x27   :  { %v174_v12 = vunpack.c.l.s4 %v1859_v11  ;;  %v171_v17 = vmul.f32 %v1416_v14, %v1991_v9  ;;  %v2015_v30 = vld [vmem:[%s2415_s2] sm:$0xff]  ;;  %v2022_v35 = vld [vmem:[%s2415_s2 + $0x8] sm:$0xff]  ;;  %v1685_v46 = vld [vmem:[%s2418_s5 + $0x10] sm:$0xff]   ;;  %s2434_s0 = sld [smem:[#allocation5_spill]]  ;;  %vm280_vm1 = vcmask 7168   ;;  %vm336_vm2 = vcmask 1041409  }
  0x28   :  { %v2005_v16 = vshrl.u32 %v176_v13, 7  ;;  %v1681_v42 = vld [vmem:[%s2418_s5] sm:$0xff]   ;;  %v1683_v44 = vld [vmem:[%s2418_s5 + $0x8] sm:$0xff]   ;;  %v1686_v47 = vld [vmem:[%s2419_s6 + $0x10] sm:$0xff]   ;;  %vm1353_vm3 = vcmask 1041408  }
  0x29   :  { %v175_v15 = vunpack.c.0.s8 %v174_v12  ;;  %v1682_v43 = vld [vmem:[%s2419_s6] sm:$0xff]   ;;  %1601 = vmatpush3.bf16.msra.mxu0 %v1681_v42  ;;  %v1684_v45 = vld [vmem:[%s2419_s6 + $0x8] sm:$0xff]   ;;  %v1687_v48 = vld [vmem:[%s2418_s5 + $0x18] sm:$0xff]  }
  0x2a   :  { %v2010_v24 = vsub.s32 0, %v2005_v16  ;;  %1581 = vmatpush3.bf16.msra.mxu1 %v1682_v43  ;;  %1602 = vmatprep.subr.bf16.mxu0 %v1857_v1  ;;  %v1688_v49 = vld [vmem:[%s2419_s6 + $0x18] sm:$0xff]   ;;  %v1689_v50 = vld [vmem:[%s2418_s5 + $0x20] sm:$0xff]   ;;  %v1691_v52 = vld [vmem:[%s2418_s5 + $0x28] sm:$0xff]  }
  0x2b   :  { %v178_v18 = vsub.s32 %v175_v15, %v2005_v16  ;;  %1582 = vmatprep.subr.bf16.mxu1 %v1857_v1  ;;  %v1690_v51 = vld [vmem:[%s2419_s6 + $0x20] sm:$0xff]   ;;  %v1692_v53 = vld [vmem:[%s2419_s6 + $0x28] sm:$0xff]   ;;  %v1693_v54 = vld [vmem:[%s2418_s5 + $0x30] sm:$0xff]  }
  0x2c   :  { %v1694_v55 = vld [vmem:[%s2419_s6 + $0x30] sm:$0xff]   ;;  %v1695_v56 = vld [vmem:[%s2418_s5 + $0x38] sm:$0xff]   ;;  %v1704_v62 = vld [vmem:[%s2421_s8 + $0x20] ss:$12 sps:$4 sm:$0xff]  }
  0x2d   :  { %v179_v19 = vrot.slane %v171_v17, %v178_v18  ;;  %1603 = vmatpush3.bf16.msra.mxu0 %v1683_v44  ;;  %v1696_v57 = vld [vmem:[%s2419_s6 + $0x38] sm:$0xff]   ;;  %v55_v58 = vld [vmem:[%s2434_s0] sm:$0x3]  ;;  %v1699_v60 = vld [vmem:[%s2421_s8 + $0x4] ss:$12 sps:$4 sm:$0xff]  }
  0x2e   :  { %1583 = vmatpush3.bf16.msra.mxu1 %v1684_v45  ;;  %1604 = vmatprep.subr.bf16.mxu0 %v1857_v1  ;;  %v297_v59 = vpack.c.bf16 %v55_v58, %v55_v58  ;;  %v1700_v61 = vld [vmem:[%s2421_s8 + $0x8] ss:$12 sps:$4 sm:$0xff]   ;;  %v1708_v63 = vld [vmem:[%s2421_s8 + $0x38] ss:$12 sps:$4 sm:$0xff]   ;;  %v1712_v0 = vld [vmem:[%s2421_s8 + $0x50] ss:$12 sps:$4 sm:$0xff]  }
  0x2f   :  { %v187_v23 = vrot.slane %v179_v19, %v178_v18  ;;  %v180_v25 = vcombine.high %v179_v19, %v179_v19  ;;  %1584 = vmatprep.subr.bf16.mxu1 %v1857_v1  ;;  %v1716_v2 = vld [vmem:[%s2421_s8 + $0x68] ss:$12 sps:$4 sm:$0xff]  }
  0x31   :  { %v233_v33 = vrot.slane %v187_v23, %v2010_v24  ;;  %v194_v34 = vrot.slane %v180_v25, %v178_v18  ;;  %1605 = vmatpush3.bf16.msra.mxu0 %v1685_v46 }
  0x32   :  { %1585 = vmatpush3.bf16.msra.mxu1 %v1686_v47  ;;  %1606 = vmatprep.subr.bf16.mxu0 %v1857_v1 }
  0x33   :  { %v237_v40 = vrot.slane %v194_v34, %v2010_v24  ;;  %1586 = vmatprep.subr.bf16.mxu1 %v1857_v1 }
  0x35   :  { %1607 = vmatpush3.bf16.msra.mxu0 %v1687_v48 }
  0x36   :  { %1587 = vmatpush3.bf16.msra.mxu1 %v1688_v49  ;;  %1608 = vmatprep.subr.bf16.mxu0 %v1857_v1 }
  0x37   :  { %1588 = vmatprep.subr.bf16.mxu1 %v1857_v1 }
  0x39   :  { %1609 = vmatpush3.bf16.msra.mxu0 %v1689_v50 }
  0x3a   :  { %1589 = vmatpush3.bf16.msra.mxu1 %v1690_v51  ;;  %1610 = vmatprep.subr.bf16.mxu0 %v1857_v1 }
  0x3b   :  { %1590 = vmatprep.subr.bf16.mxu1 %v1857_v1 }
  0x3d   :  { %1611 = vmatpush3.bf16.msra.mxu0 %v1691_v52 }
  0x3e   :  { %1591 = vmatpush3.bf16.msra.mxu1 %v1692_v53  ;;  %1612 = vmatprep.subr.bf16.mxu0 %v1857_v1 }
  0x3f   :  { %1592 = vmatprep.subr.bf16.mxu1 %v1857_v1 }
  0x41   :  { %1613 = vmatpush3.bf16.msra.mxu0 %v1693_v54 }
  0x42   :  { %1593 = vmatpush3.bf16.msra.mxu1 %v1694_v55  ;;  %1614 = vmatprep.subr.bf16.mxu0 %v1857_v1 }
  0x43   :  { %1594 = vmatprep.subr.bf16.mxu1 %v1857_v1 }
  0x45   :  { %1615 = vmatpush3.bf16.msra.mxu0 %v1695_v56 }
  0x46   :  { %1595 = vmatpush3.bf16.msra.mxu1 %v1696_v57  ;;  %1620 = vmatprep.subr.bf16.mxu0 %v1857_v1 }
  0x47   :  { %703 = vmatprep.subr.bf16.mxu1 %v1699_v60 }
  0x48   :  { %1617 = vmatmul.mubr.bf16.vlgmr.msra.gmra.mrb[4].mxu0 %v297_v59 }
  0x49   :  { %1636 = vmatprep.mubr.msk.bf16.mxu0 %vm1858_vm0, %v1857_v1  ;;  %1621 = vmatpush3.bf16.msra.mxu0 %v1700_v61 }
  0x4a   :  { %1622 = vmatprep.subr.bf16.mxu0 %v1857_v1 }
  0x4d   :  { %1623 = vmatpush3.bf16.msra.mxu0 %v1704_v62 }
  0x4e   :  { %1624 = vmatprep.subr.bf16.mxu0 %v1857_v1 }
  0x51   :  { %1625 = vmatpush3.bf16.msra.mxu0 %v1708_v63 }
  0x52   :  { %1626 = vmatprep.subr.bf16.mxu0 %v1857_v1 }
  0x55   :  { %1627 = vmatpush3.bf16.msra.mxu0 %v1712_v0 }
  0x56   :  { %1628 = vmatprep.subr.bf16.mxu0 %v1857_v1 }
  0x59   :  { %1629 = vmatpush3.bf16.msra.mxu0 %v1716_v2  ;;  %v1703_v2 = vld [vmem:[%s2421_s8 + $0x1c] ss:$12 sps:$4 sm:$0xff]  }
  0x5a   :  { %1630 = vmatprep.subr.bf16.mxu0 %v1857_v1 }
  0xf7   :  { %v158_v20 = vpop.f32.mrb[0].mxu0 }
  0xf8   :  { %v202_v21 = vrot.slane %v158_v20, %v178_v18  ;;  %v1578_v22 = vpop.f32.mrb[1].mxu0 }
  0xf9   :  { %v161_v26 = vpop.f32.mrb[2].mxu0 }
  0xfa   :  { %v203_v27 = vcombine.high %v202_v21, %v202_v21  ;;  %v210_v28 = vrot.slane %v202_v21, %v178_v18  ;;  %v1579_v29 = vpop.f32.mrb[3].mxu0  ;;  %v1720_v26 = vld [vmem:[%s2421_s8 + $0x80] ss:$12 sps:$4 sm:$0xff]  }
  0xfb   :  { %1631 = vmatpush3.bf16.msra.mxu0 %v1720_v26  ;;  %v1731_v26 = vld [vmem:[%s2423_s10 + $0x4] ss:$12 sps:$4 sm:$0xff]  }
  0xfc   :  { %v217_v31 = vrot.slane %v203_v27, %v178_v18  ;;  %v221_v32 = vrot.slane %v210_v28, %v2010_v24  ;;  %1632 = vmatprep.subr.bf16.mxu0 %v1857_v1 }
  0xfe   :  { %v228_v36 = vmul.f32 %v221_v32, %v2015_v30  ;;  %v225_v37 = vrot.slane %v217_v31, %v2010_v24 }
 0x100   :  { %v240_v38 = vadd.f32 %v233_v33, %v228_v36  ;;  %v229_v39 = vmul.f32 %v225_v37, %v2022_v35 }
 0x102   :  { %242 = vadd.xlane.f32.xlu0 %v240_v38  ;;  %v241_v41 = vadd.f32 %v237_v40, %v229_v39 }
 0x106   :  { %244 = vadd.xlane.f32.xlu0 %v241_v41 }
 0x18f   :  { %v243_v3 = vpop.xlane.xlu0 %242 }
 0x190   :  { %v246_v4 = vrot.slane %v243_v3, 4 }
 0x192   :  { %v247_v5 = vmax.f32 %v243_v3, %v246_v4  ;;  %v1707_v4 = vld [vmem:[%s2421_s8 + $0x34] ss:$12 sps:$4 sm:$0xff]  }
 0x193   :  { %v245_v6 = vpop.xlane.xlu0 %244 }
 0x194   :  { %v248_v7 = vrot.slane %v247_v5, 2  ;;  %v252_v8 = vrot.slane %v245_v6, 4 }
 0x196   :  { %v249_v11 = vmax.f32 %v247_v5, %v248_v7  ;;  %v253_v12 = vmax.f32 %v245_v6, %v252_v8  ;;  %v1705_v5 = vld [vmem:[%s2421_s8 + $0x30] ss:$12 sps:$4 sm:$0xff]   ;;  %v1709_v7 = vld [vmem:[%s2421_s8 + $0x48] ss:$12 sps:$4 sm:$0xff]  }
 0x197   :  { %v1715_v8 = vld [vmem:[%s2421_s8 + $0x64] ss:$12 sps:$4 sm:$0xff]  }
 0x198   :  { %v250_v13 = vrot.slane %v249_v11, 1  ;;  %v254_v14 = vrot.slane %v253_v12, 2 }
 0x19a   :  { %v251_v15 = vmax.f32 %v249_v11, %v250_v13  ;;  %v255_v17 = vmax.f32 %v253_v12, %v254_v14  ;;  %v1713_v11 = vld [vmem:[%s2421_s8 + $0x60] ss:$12 sps:$4 sm:$0xff]   ;;  %v1719_v12 = vld [vmem:[%s2421_s8 + $0x7c] ss:$12 sps:$4 sm:$0xff]   ;;  %v1717_v13 = vld [vmem:[%s2421_s8 + $0x78] ss:$12 sps:$4 sm:$0xff]  }
 0x19b   :  { %v510_v14 = vpop.f32.mrb[4].mxu0 }
 0x19c   :  { %v258_v18 = vsub.f32 %v243_v3, %v251_v15  ;;  %v256_v19 = vrot.slane %v255_v17, 1  ;;  %v1701_v3 = vld [vmem:[%s2421_s8 + $0x18] ss:$12 sps:$4 sm:$0xff]   ;;  %v1618_v15 = vpop.f32.mrb[5].mxu0 }
 0x19d   :  { %v1785_v15 = vld [vmem:[%s2425_s12] ss:$8 sps:$4 sm:$0xff]  }
 0x19e   :  { %v260_v20 = vmul.f32 1.442695, %v258_v18  ;;  %v257_v21 = vmax.f32 %v255_v17, %v256_v19  ;;  %v513_v17 = vpop.f32.mrb[6].mxu0  ;;  %v1723_v19 = vld [vmem:[%s2421_s8 + $0x94] ss:$12 sps:$4 sm:$0xff]  }
 0x19f   :  { %v1619_v18 = vpop.f32.mrb[7].mxu0  ;;  %v1788_v17 = vld [vmem:[%s2425_s12 + $0x10] ss:$8 sps:$4 sm:$0xff]  }
 0x1a0   :  { %1809 = vpow2.f32 %v260_v20  ;;  %v259_v22 = vsub.f32 %v245_v6, %v257_v21  ;;  %v1711_v6 = vld [vmem:[%s2421_s8 + $0x4c] ss:$12 sps:$4 sm:$0xff]   ;;  %v1721_v20 = vld [vmem:[%s2421_s8 + $0x90] ss:$12 sps:$4 sm:$0xff]  }
 0x1a1   :  { %v1724_v21 = vld [vmem:[%s2421_s8 + $0x98] ss:$12 sps:$4 sm:$0xff]   ;;  %v1790_v18 = vld [vmem:[%s2425_s12 + $0x14] ss:$8 sps:$4 sm:$0xff]  }
 0x1a2   :  { %v262_v23 = vmul.f32 1.442695, %v259_v22  ;;  %1633 = vmatpush3.bf16.msra.mxu0 %v1724_v21  ;;  %v1727_v22 = vld [vmem:[%s2421_s8 + $0xac] ss:$12 sps:$4 sm:$0xff]  }
 0x1a3   :  { %1634 = vmatprep.subr.bf16.mxu0 %v1857_v1  ;;  %v1794_v21 = vld [vmem:[%s2425_s12 + $0x30] ss:$8 sps:$4 sm:$0xff]  }
 0x1a4   :  { %1811 = vpow2.f32 %v262_v23  ;;  %v1725_v23 = vld [vmem:[%s2421_s8 + $0xa8] ss:$12 sps:$4 sm:$0xff]  }
 0x1aa   :  { %v1810_v25 = vpop.eup %1809 }
 0x1ab   :  { %v264_v27 = vrot.slane %v1810_v25, 4 }
 0x1ad   :  { %v265_v28 = vadd.f32 %v1810_v25, %v264_v27  ;;  %v1860_v27 = vmov 0  }
 0x1ae   :  { %v1812_v29 = vpop.eup %1811 }
 0x1af   :  { %v266_v31 = vrot.slane %v265_v28, 2  ;;  %v270_v32 = vrot.slane %v1812_v29, 4 }
 0x1b1   :  { %v271_v33 = vadd.f32 %v1812_v29, %v270_v32  ;;  %v267_v34 = vadd.f32 %v266_v31, %v265_v28 }
 0x1b3   :  { %v272_v36 = vrot.slane %v271_v33, 2  ;;  %v268_v37 = vrot.slane %v267_v34, 1 }
 0x1b5   :  { %v273_v38 = vadd.f32 %v272_v36, %v271_v33  ;;  %v269_v39 = vadd.f32 %v268_v37, %v267_v34 }
 0x1b7   :  { %v274_v40 = vrot.slane %v273_v38, 1  ;;  %1813 = vrcp.f32 %v269_v39  ;;  %v1750_v39 = vld [vmem:[%s2423_s10 + $0x8] ss:$12 sps:$4 sm:$0xff]  }
 0x1b9   :  { %v275_v41 = vadd.f32 %v274_v40, %v273_v38  ;;  %v1729_v38 = vld [vmem:[%s2423_s10] ss:$12 sps:$4 sm:$0xff]  }
 0x1bb   :  { %1815 = vrcp.f32 %v275_v41  ;;  %v1734_v41 = vld [vmem:[%s2423_s10 + $0x1c] ss:$12 sps:$4 sm:$0xff]  }
 0x1c1   :  { %v1814_v42 = vpop.eup %1813 }
 0x1c2   :  { %v277_v43 = vmul.f32 %v1814_v42, %v1810_v25  ;;  %v1728_v25 = vld [vmem:[%s2421_s8 + $0xb0] ss:$12 sps:$4 sm:$0xff]   ;;  %v1732_v42 = vld [vmem:[%s2423_s10 + $0x18] ss:$12 sps:$4 sm:$0xff]  }
 0x1c3   :  { %1635 = vmatpush3.bf16.msra.mxu0 %v1728_v25  ;;  %v1802_v25 = vld [vmem:[%s2425_s12 + $0x54] ss:$8 sps:$4 sm:$0xff]  }
 0x1c4   :  { %281 = vst.msk [vmem:[%s2430_s17] sm:$0xff] %vm280_vm1, %v277_v43  ;;  %v283_v44 = vmul.f32 %v277_v43, %v2015_v30  ;;  %1640 = vmatprep.subr.bf16.mxu0 %v1857_v1  ;;  %v1754_v43 = vld [vmem:[%s2423_s10 + $0x20] ss:$12 sps:$4 sm:$0xff]  }
 0x1c5   :  { %v1816_v45 = vpop.eup %1815 }
 0x1c6   :  { %v279_v46 = vmul.f32 %v1816_v45, %v1812_v29  ;;  %v285_v47 = vrot.slane %v283_v44, 4  ;;  %v1433_v29 = vld [vmem:[%s2420_s7] ss:$0 sm:$0xff]  ;;  %v1735_v45 = vld [vmem:[%s2423_s10 + $0x30] ss:$12 sps:$4 sm:$0xff]  }
 0x1c8   :  { %282 = vst.msk [vmem:[%s2430_s17 + $0x8] sm:$0xff] %vm280_vm1, %v279_v46  ;;  %v284_v48 = vmul.f32 %v279_v46, %v2022_v35  ;;  %v286_v49 = vadd.f32 %v285_v47, %v283_v44  ;;  %v1697_v35 = vld [vmem:[%s2421_s8] ss:$12 sps:$4 sm:$0xff]   ;;  %v1758_v46 = vld [vmem:[%s2423_s10 + $0x38] ss:$12 sps:$4 sm:$0xff]  }
 0x1c9   :  { %v1737_v44 = vld [vmem:[%s2423_s10 + $0x34] ss:$12 sps:$4 sm:$0xff]   ;;  %v1740_v47 = vld [vmem:[%s2423_s10 + $0x4c] ss:$12 sps:$4 sm:$0xff]  }
 0x1ca   :  { %v287_v50 = vrot.slane %v286_v49, 2  ;;  %v291_v51 = vrot.slane %v284_v48, 4 }
 0x1cc   :  { %v288_v52 = vadd.f32 %v287_v50, %v286_v49  ;;  %v292_v53 = vadd.f32 %v291_v51, %v284_v48  ;;  %v1738_v48 = vld [vmem:[%s2423_s10 + $0x48] ss:$12 sps:$4 sm:$0xff]   ;;  %v1762_v49 = vld [vmem:[%s2423_s10 + $0x50] ss:$12 sps:$4 sm:$0xff]   ;;  %v1741_v51 = vld [vmem:[%s2423_s10 + $0x60] ss:$12 sps:$4 sm:$0xff]  }
 0x1cd   :  { %v1743_v50 = vld [vmem:[%s2423_s10 + $0x64] ss:$12 sps:$4 sm:$0xff]  }
 0x1ce   :  { %v289_v54 = vrot.slane %v288_v52, 1  ;;  %v293_v55 = vrot.slane %v292_v53, 2 }
 0x1d0   :  { %v290_v56 = vadd.f32 %v289_v54, %v288_v52  ;;  %v294_v57 = vadd.f32 %v293_v55, %v292_v53  ;;  %v1766_v52 = vld [vmem:[%s2423_s10 + $0x68] ss:$12 sps:$4 sm:$0xff]   ;;  %v1744_v54 = vld [vmem:[%s2423_s10 + $0x78] ss:$12 sps:$4 sm:$0xff]   ;;  %v1770_v55 = vld [vmem:[%s2423_s10 + $0x80] ss:$12 sps:$4 sm:$0xff]  }
 0x1d1   :  { %v1746_v53 = vld [vmem:[%s2423_s10 + $0x7c] ss:$12 sps:$4 sm:$0xff]  }
 0x1d2   :  { %v295_v58 = vrot.slane %v294_v57, 1  ;;  %v314_v59 = vpack.c.bf16 %v290_v56, %v290_v56  ;;  %v1749_v56 = vld [vmem:[%s2423_s10 + $0x94] ss:$12 sps:$4 sm:$0xff]  }
 0x1d4   :  { %v296_v30 = vadd.f32 %v295_v58, %v294_v57  ;;  %v334_v61 = vunpack.c.l.b16 %v314_v59  ;;  %v1747_v57 = vld [vmem:[%s2423_s10 + $0x90] ss:$12 sps:$4 sm:$0xff]   ;;  %v1774_v58 = vld [vmem:[%s2423_s10 + $0x98] ss:$12 sps:$4 sm:$0xff]   ;;  %v1751_v59 = vld [vmem:[%s2423_s10 + $0xa8] ss:$12 sps:$4 sm:$0xff]  }
 0x1d6   :  { %v315_v60 = vpack.c.bf16 %v296_v30, %v296_v30  ;;  %v1753_v30 = vld [vmem:[%s2423_s10 + $0xac] ss:$12 sps:$4 sm:$0xff]  }
 0x1d8   :  { %v335_v62 = vunpack.c.l.b16 %v315_v60  ;;  %v1778_v60 = vld [vmem:[%s2423_s10 + $0xb0] ss:$12 sps:$4 sm:$0xff]  }
 0x1da   :  { %v337_v63 = vsel %vm336_vm2, %v335_v62, %v334_v61  ;;  %v1757_v61 = vld [vmem:[%s2426_s13 + $0x4] ss:$8 sps:$4 sm:$0xff]   ;;  %v1755_v62 = vld [vmem:[%s2426_s13] ss:$8 sps:$4 sm:$0xff]  }
 0x1db   :  { %v2134_v0 = vpack.c.b16 %v337_v63, %v337_v63  ;;  %v1761_v63 = vld [vmem:[%s2426_s13 + $0x14] ss:$8 sps:$4 sm:$0xff]  }
 0x1dd   :  { %1597 = vmatmul.mubr.bf16.vlgmr.msra.gmra.mrb[0].mxu1 %v2134_v0 }
 0x1de   :  { %704 = vmatpush1.bf16.msra.mxu1 %v1697_v35  ;;  %735 = vmatprep.mubr.bf16.mxu1 %v1860_v27  ;;  %v1765_v35 = vld [vmem:[%s2426_s13 + $0x24] ss:$8 sps:$4 sm:$0xff]  }
 0x1df   :  { %705 = vmatprep.subr.bf16.mxu1 %v1703_v2  ;;  %v1763_v2 = vld [vmem:[%s2426_s13 + $0x20] ss:$8 sps:$4 sm:$0xff]  }
 0x1e2   :  { %706 = vmatpush1.bf16.msra.mxu1 %v1701_v3  ;;  %v1767_v3 = vld [vmem:[%s2426_s13 + $0x30] ss:$8 sps:$4 sm:$0xff]  }
 0x1e3   :  { %707 = vmatprep.subr.bf16.mxu1 %v1707_v4  ;;  %v1773_v4 = vld [vmem:[%s2426_s13 + $0x44] ss:$8 sps:$4 sm:$0xff]  }
 0x1e6   :  { %708 = vmatpush1.bf16.msra.mxu1 %v1705_v5  ;;  %v1771_v5 = vld [vmem:[%s2426_s13 + $0x40] ss:$8 sps:$4 sm:$0xff]  }
 0x1e7   :  { %709 = vmatprep.subr.bf16.mxu1 %v1711_v6  ;;  %v1777_v6 = vld [vmem:[%s2426_s13 + $0x54] ss:$8 sps:$4 sm:$0xff]  }
 0x1ea   :  { %710 = vmatpush1.bf16.msra.mxu1 %v1709_v7  ;;  %v1775_v7 = vld [vmem:[%s2426_s13 + $0x50] ss:$8 sps:$4 sm:$0xff]  }
 0x1eb   :  { %711 = vmatprep.subr.bf16.mxu1 %v1715_v8  ;;  %v1781_v8 = vld [vmem:[%s2426_s13 + $0x64] ss:$8 sps:$4 sm:$0xff]  }
 0x1ee   :  { %712 = vmatpush1.bf16.msra.mxu1 %v1713_v11  ;;  %v1779_v11 = vld [vmem:[%s2426_s13 + $0x60] ss:$8 sps:$4 sm:$0xff]  }
 0x1ef   :  { %713 = vmatprep.subr.bf16.mxu1 %v1719_v12  ;;  %v1784_v12 = vld [vmem:[%s2426_s13 + $0x74] ss:$8 sps:$4 sm:$0xff]  }
 0x1f2   :  { %714 = vmatpush1.bf16.msra.mxu1 %v1717_v13  ;;  %v1782_v13 = vld [vmem:[%s2426_s13 + $0x70] ss:$8 sps:$4 sm:$0xff]  }
 0x1f3   :  { %715 = vmatprep.subr.bf16.mxu1 %v1723_v19  ;;  %v1791_v19 = vld [vmem:[%s2425_s12 + $0x20] ss:$8 sps:$4 sm:$0xff]  }
 0x1f6   :  { %716 = vmatpush1.bf16.msra.mxu1 %v1721_v20  ;;  %v1796_v20 = vld [vmem:[%s2425_s12 + $0x34] ss:$8 sps:$4 sm:$0xff]  }
 0x1f7   :  { %717 = vmatprep.subr.bf16.mxu1 %v1727_v22  ;;  %v1799_v22 = vld [vmem:[%s2425_s12 + $0x44] ss:$8 sps:$4 sm:$0xff]  }
 0x1fa   :  { %718 = vmatpush1.bf16.msra.mxu1 %v1725_v23  ;;  %v1797_v23 = vld [vmem:[%s2425_s12 + $0x40] ss:$8 sps:$4 sm:$0xff]  }
 0x1fb   :  { %961 = vmatprep.subr.bf16.mxu1 %v1731_v26  ;;  %v1800_v26 = vld [vmem:[%s2425_s12 + $0x50] ss:$8 sps:$4 sm:$0xff]  }
 0x2b0   :  { %v422_v28 = vpop.f32.mrb[0].mxu1 }
 0x2b1   :  { %v511_v31 = vadd.f32 %v510_v14, %v422_v28  ;;  %v1598_v32 = vpop.f32.mrb[1].mxu1  ;;  %v1787_v14 = vld [vmem:[%s2425_s12 + $0x4] ss:$8 sps:$4 sm:$0xff]   ;;  %v1803_v28 = vld [vmem:[%s2425_s12 + $0x60] ss:$8 sps:$4 sm:$0xff]  }
 0x2b2   :  { %v425_v33 = vpop.f32.mrb[2].mxu1 }
 0x2b3   :  { %v523_v34 = vadd.f32 %v1433_v29, %v511_v31  ;;  %v1599_v36 = vpop.f32.mrb[3].mxu1  ;;  %v1808_v29 = vld [vmem:[%s2425_s12 + $0x74] ss:$8 sps:$4 sm:$0xff]   ;;  %v1806_v31 = vld [vmem:[%s2425_s12 + $0x70] ss:$8 sps:$4 sm:$0xff]  }
 0x2b5   :  { %v524_v37 = vmax.f32 %v523_v34, 0.0 }
 0x2b7   :  { %v525_v40 = vpack.c.bf16 %v524_v37, %v524_v37  ;;  %v816_v37 = vld [vmem:[%s2424_s11] sm:$0x7] }
 0x2b9   :  { %736 = vmatmul.mubr.bf16.vlgmr.msra.gmra.mrb[4].mxu1 %v525_v40  ;;  %1637 = vmatmul.mubr.bf16.vlgmr.msra.gmra.mrb[8].mxu0 %v525_v40 }
 0x2ba   :  { %962 = vmatpush1.bf16.msra.mxu1 %v1729_v38  ;;  %1641 = vmatpush3.bf16.msra.mxu0 %v1750_v39  ;;  %v2378_v38 = vsub.s32 1, %v2005_v16  ;;  %v558_v39 = vld [vmem:[%s2422_s9] sm:$0x7] }
 0x2bb   :  { %963 = vmatprep.subr.bf16.mxu1 %v1734_v41  ;;  %1642 = vmatprep.subr.bf16.mxu0 %v1857_v1  ;;  %v563_v40 = vrot.slane %v558_v39, %v2010_v24  ;;  %v821_v41 = vrot.slane %v816_v37, %v2010_v24 }
 0x2bc   :  { %993 = vmatprep.mubr.bf16.mxu1 %v1860_v27  ;;  %1656 = vmatprep.mubr.msk.bf16.mxu0 %vm1858_vm0, %v1857_v1 }
 0x2be   :  { %964 = vmatpush1.bf16.msra.mxu1 %v1732_v42  ;;  %1643 = vmatpush3.bf16.msra.mxu0 %v1754_v43  ;;  %v567_v42 = vrot.slane %v558_v39, %v2378_v38  ;;  %v825_v43 = vrot.slane %v816_v37, %v2378_v38 }
 0x2bf   :  { %965 = vmatprep.subr.bf16.mxu1 %v1737_v44  ;;  %1644 = vmatprep.subr.bf16.mxu0 %v1857_v1  ;;  %v1660_v44 = vadd.f32 %v821_v41, %v563_v40 }
 0x2c2   :  { %966 = vmatpush1.bf16.msra.mxu1 %v1735_v45  ;;  %1645 = vmatpush3.bf16.msra.mxu0 %v1758_v46  ;;  %v1662_v45 = vadd.f32 %v825_v43, %v567_v42 }
 0x2c3   :  { %967 = vmatprep.subr.bf16.mxu1 %v1740_v47  ;;  %1646 = vmatprep.subr.bf16.mxu0 %v1857_v1 }
 0x2c6   :  { %968 = vmatpush1.bf16.msra.mxu1 %v1738_v48  ;;  %1647 = vmatpush3.bf16.msra.mxu0 %v1762_v49 }
 0x2c7   :  { %969 = vmatprep.subr.bf16.mxu1 %v1743_v50  ;;  %1648 = vmatprep.subr.bf16.mxu0 %v1857_v1 }
 0x2ca   :  { %970 = vmatpush1.bf16.msra.mxu1 %v1741_v51  ;;  %1649 = vmatpush3.bf16.msra.mxu0 %v1766_v52 }
 0x2cb   :  { %971 = vmatprep.subr.bf16.mxu1 %v1746_v53  ;;  %1650 = vmatprep.subr.bf16.mxu0 %v1857_v1 }
 0x2ce   :  { %972 = vmatpush1.bf16.msra.mxu1 %v1744_v54  ;;  %1651 = vmatpush3.bf16.msra.mxu0 %v1770_v55 }
 0x2cf   :  { %973 = vmatprep.subr.bf16.mxu1 %v1749_v56  ;;  %1652 = vmatprep.subr.bf16.mxu0 %v1857_v1 }
 0x2d2   :  { %974 = vmatpush1.bf16.msra.mxu1 %v1747_v57  ;;  %1653 = vmatpush3.bf16.msra.mxu0 %v1774_v58 }
 0x2d3   :  { %975 = vmatprep.subr.bf16.mxu1 %v1753_v30  ;;  %1654 = vmatprep.subr.bf16.mxu0 %v1857_v1  ;;  %v1759_v1 = vld [vmem:[%s2426_s13 + $0x10] ss:$8 sps:$4 sm:$0xff]  }
 0x2d6   :  { %976 = vmatpush1.bf16.msra.mxu1 %v1751_v59  ;;  %1655 = vmatpush3.bf16.msra.mxu0 %v1778_v60 }
 0x2d7   :  { %1177 = vmatprep.subr.bf16.mxu1 %v1757_v61  ;;  %1298 = vmatprep.subr.bf16.mxu0 %v1787_v14  ;;  %v570_v61 = vsub.s32 2, %v2005_v16 }
 0x2d9   :  { %994 = vmatmul.mubr.bf16.vlgmr.msra.gmra.mrb[4].mxu1 %v1996_v10  ;;  %1657 = vmatmul.mubr.bf16.vlgmr.msra.gmra.mrb[12].mxu0 %v1996_v10  ;;  %v1769_v10 = vld [vmem:[%s2426_s13 + $0x34] ss:$8 sps:$4 sm:$0xff]  }
 0x2da   :  { %1178 = vmatpush1.bf16.msra.mxu1 %v1755_v62  ;;  %1209 = vmatprep.mubr.bf16.mxu1 %v1860_v27  ;;  %v829_v62 = vrot.slane %v816_v37, %v570_v61 }
 0x2db   :  { %1179 = vmatprep.subr.bf16.mxu1 %v1761_v63  ;;  %1330 = vmatprep.mubr.bf16.mxu0 %v1860_v27  ;;  %v1805_v27 = vld [vmem:[%s2425_s12 + $0x64] ss:$8 sps:$4 sm:$0xff]  }
 0x2dc   :  { %1299 = vmatpush1.bf16.msra.mxu0 %v1785_v15 }
 0x2dd   :  { %1300 = vmatprep.subr.bf16.mxu0 %v1790_v18 }
 0x2de   :  { %1180 = vmatpush1.bf16.msra.mxu1 %v1759_v1  ;;  %v571_v1 = vrot.slane %v558_v39, %v570_v61 }
 0x2df   :  { %1181 = vmatprep.subr.bf16.mxu1 %v1765_v35 }
 0x2e0   :  { %1301 = vmatpush1.bf16.msra.mxu0 %v1788_v17 }
 0x2e2   :  { %1182 = vmatpush1.bf16.msra.mxu1 %v1763_v2 }
 0x2e3   :  { %1183 = vmatprep.subr.bf16.mxu1 %v1769_v10 }
 0x2e6   :  { %1184 = vmatpush1.bf16.msra.mxu1 %v1767_v3 }
 0x2e7   :  { %1185 = vmatprep.subr.bf16.mxu1 %v1773_v4 }
 0x2ea   :  { %1186 = vmatpush1.bf16.msra.mxu1 %v1771_v5 }
 0x2eb   :  { %1187 = vmatprep.subr.bf16.mxu1 %v1777_v6 }
 0x2ee   :  { %1188 = vmatpush1.bf16.msra.mxu1 %v1775_v7 }
 0x2ef   :  { %1189 = vmatprep.subr.bf16.mxu1 %v1781_v8 }
 0x2f2   :  { %1190 = vmatpush1.bf16.msra.mxu1 %v1779_v11 }
 0x2f3   :  { %1191 = vmatprep.subr.bf16.mxu1 %v1784_v12 }
 0x2f6   :  { %1192 = vmatpush1.bf16.msra.mxu1 %v1782_v13 }
 0x2f9   :  { %1210 = vmatmul.mubr.bf16.vlgmr.msra.gmra.mrb[8].mxu1 %v2134_v0  ;;  %v1793_v0 = vld [vmem:[%s2425_s12 + $0x24] ss:$8 sps:$4 sm:$0xff]   ;;  %s1861_s12 = smov [#allocation2]  }
 0x2fa   :  { %1302 = vmatprep.subr.bf16.mxu0 %v1793_v0  ;;  %v1339_v0 = vld [vmem:[%s2427_s14] sm:$0x3]  ;;  %s1394_s14 = sshll.u32 %s1861_s12, 4  ;;  %s1395_s14 = int_to_ptr.vmem [resolvable:$true] %s1394_s14 }
 0x2fb   :  { %1303 = vmatpush1.bf16.msra.mxu0 %v1791_v19  ;;  %v1344_v19 = vrot.slane %v1339_v0, %v2010_v24  ;;  %s1833_s21 = scalar_lea.vmem %s1395_s14, 32  ;;  %p1838_p1 = scmp.lt.s32.totalorder %s1395_s14, %s1395_s14 }
 0x2fc   :  { %1304 = vmatprep.subr.bf16.mxu0 %v1796_v20  ;;  %p1834_p0 = scmp.ne.s32.totalorder %s1395_s14, %s1833_s21  ;;  %p1839_p2 = scmp.lt.s32.totalorder %s1833_s21, %s1833_s21 }
 0x2fe   :  { %p1840_p3 = por %p1839_p2, %p1838_p1 }
 0x2ff   :  { %1305 = vmatpush1.bf16.msra.mxu0 %v1794_v21  ;;  %v1348_v21 = vrot.slane %v1339_v0, %v2378_v38 }
 0x300   :  { %1306 = vmatprep.subr.bf16.mxu0 %v1799_v22  ;;  %p1841_p4 = pnand %p1840_p3, %p1834_p0 }
 0x303   :  { %1307 = vmatpush1.bf16.msra.mxu0 %v1797_v23 }
 0x304   :  { %1308 = vmatprep.subr.bf16.mxu0 %v1802_v25 }
 0x307   :  { %1309 = vmatpush1.bf16.msra.mxu0 %v1800_v26 }
 0x308   :  { %1310 = vmatprep.subr.bf16.mxu0 %v1805_v27 }
 0x30b   :  { %1311 = vmatpush1.bf16.msra.mxu0 %v1803_v28 }
 0x30c   :  { %1312 = vmatprep.subr.bf16.mxu0 %v1808_v29 }
 0x30f   :  { %1313 = vmatpush1.bf16.msra.mxu0 %v1806_v31 }
 0x38c   :  { %v778_v32 = vpop.f32.mrb[8].mxu0 }
 0x38d   :  { %v1638_v33 = vpop.f32.mrb[9].mxu0  ;;  %v779_v3 = vadd.f32 %v778_v32, %v571_v1 }
 0x38e   :  { %v781_v34 = vpop.f32.mrb[10].mxu0 }
 0x38f   :  { %v1639_v36 = vpop.f32.mrb[11].mxu0 }
 0x3ac   :  { %v995_v46 = vpop.f32.mrb[4].mxu1  ;;  %v1036_v47 = vpop.f32.mrb[12].mxu0 }
 0x3ad   :  { %v1661_v48 = vadd.f32 %v1660_v44, %v995_v46  ;;  %v997_v49 = vpop.f32.mrb[5].mxu1  ;;  %v1658_v50 = vpop.f32.mrb[13].mxu0  ;;  %v1037_v2 = vadd.f32 %v1036_v47, %v829_v62 }
 0x3ae   :  { %v1663_v51 = vadd.f32 %v1662_v45, %v997_v49  ;;  %v999_v52 = vpop.f32.mrb[6].mxu1  ;;  %v1039_v53 = vpop.f32.mrb[14].mxu0 }
 0x3af   :  { %v1043_v54 = vsub.f32 0.0, %v1661_v48  ;;  %v1000_v55 = vpop.f32.mrb[7].mxu1  ;;  %v1659_v56 = vpop.f32.mrb[15].mxu0 }
 0x3b0   :  { %v1050_v58 = vsub.f32 0.0, %v1663_v51 }
 0x3b1   :  { %v1044_v57 = vmul.f32 1.442695, %v1043_v54 }
 0x3b2   :  { %v1051_v30 = vmul.f32 1.442695, %v1050_v58 }
 0x3b3   :  { %1817 = vpow2.f32 %v1044_v57 }
 0x3b4   :  { %1819 = vpow2.f32 %v1051_v30 }
 0x3bd   :  { %v1818_v59 = vpop.eup %1817 }
 0x3be   :  { %v1046_v60 = vadd.f32 1.0, %v1818_v59  ;;  %v1820_v63 = vpop.eup %1819 }
 0x3bf   :  { %v1053_v35 = vadd.f32 1.0, %v1820_v63 }
 0x3c0   :  { %1821 = vrcp.f32 %v1046_v60 }
 0x3c1   :  { %1823 = vrcp.f32 %v1053_v35 }
 0x3ca   :  { %v1822_v10 = vpop.eup %1821 }
 0x3cb   :  { %v1056_v4 = vmul.f32 %v1822_v10, %v1037_v2  ;;  %v1824_v12 = vpop.eup %1823 }
 0x3cc   :  { %v1211_v5 = vpop.f32.mrb[8].mxu1  ;;  %v1059_v13 = vsub.f32 1.0, %v1824_v12  ;;  %v1061_v16 = vmul.f32 %v1824_v12, %v1991_v9 }
 0x3cd   :  { %v1057_v6 = vadd.f32 %v1056_v4, %v779_v3  ;;  %v1213_v7 = vpop.f32.mrb[9].mxu1 }
 0x3ce   :  { %v1215_v8 = vpop.f32.mrb[10].mxu1 }
 0x3cf   :  { %1825 = vtanh.f32 %v1057_v6  ;;  %v1216_v11 = vpop.f32.mrb[11].mxu1 }
 0x3d9   :  { %v1826_v14 = vpop.eup %1825 }
 0x3da   :  { %v1060_v15 = vmul.f32 %v1826_v14, %v1059_v13 }
 0x3dc   :  { %v1062_v17 = vadd.f32 %v1061_v16, %v1060_v15 }
 0x3de   :  { %v1064_v18 = vpack.c.bf16 %v1062_v17, %v1062_v17  ;;  %1063 = vst [vmem:[#allocation2] sm:$0x3] %v1062_v17 }
 0x3e0   :  { %1331 = vmatmul.mubr.bf16.vlgmr.msra.gmra.mrb[16].mxu0 %v1064_v18 }
 0x4b3   :  { %v1332_v20 = vpop.f32.mrb[16].mxu0 }
 0x4b4   :  { %v1333_v22 = vadd.f32 %v1332_v20, %v1211_v5  ;;  %v1334_v23 = vpop.f32.mrb[17].mxu0 }
 0x4b5   :  { %v1335_v25 = vadd.f32 %v1334_v23, %v1213_v7  ;;  %v1336_v26 = vpop.f32.mrb[18].mxu0 }
 0x4b6   :  { %v1351_v27 = vadd.f32 %v1344_v19, %v1333_v22  ;;  %v1337_v9 = vpop.f32.mrb[19].mxu0 }
 0x4b7   :  { %v1352_v28 = vadd.f32 %v1348_v21, %v1335_v25 }
 0x4b8   :  { %v1354_v29 = vsel %vm1353_vm3, %v1351_v27, -inf }
 0x4b9   :  { %v1355_v31 = vsel %vm1353_vm3, %v1352_v28, -inf }
 0x4ba   :  { %v1356_v32 = vmax.f32 %v1354_v29, %v1355_v31 }
 0x4bc   :  { %1357 = vmax.xlane.f32.xlu1 %v1356_v32 }
 0x549   :  { %v1358_v33 = vpop.xlane.xlu1 %1357 }
 0x54a   :  { %v1359_v34 = vsub.f32 %v1351_v27, %v1358_v33  ;;  %v1360_v24 = vsub.f32 %v1352_v28, %v1358_v33 }
 0x54c   :  { %v1361_v36 = vmul.f32 1.442695, %v1359_v34  ;;  %v1363_v37 = vmul.f32 1.442695, %v1360_v24 }
 0x54e   :  { %1827 = vpow2.f32 %v1361_v36 }
 0x54f   :  { %1829 = vpow2.f32 %v1363_v37 }
 0x558   :  { %v1828_v38 = vpop.eup %1827 }
 0x559   :  { %v1830_v39 = vpop.eup %1829  ;;  %v1365_v40 = vsel %vm1353_vm3, %v1828_v38, 0.0 }
 0x55a   :  { %v1366_v41 = vsel %vm1353_vm3, %v1830_v39, 0.0 }
 0x55b   :  { %v1367_v42 = vadd.f32 %v1366_v41, %v1365_v40 }
 0x55d   :  { %1368 = vadd.xlane.f32.xlu1 %v1367_v42 }
 0x55e   :  { %1844 = shalt.err (!%p1841_p4)
}
 0x55f   :  { %s1845_s24 = scalar_lea.hbm %s2429_s16, 32 }
 0x560   :  { %p1846_p5 = scmp.ne.s32.totalorder %s2429_s16, %s1845_s24  ;;  %p1849_p6 = scmp.lt.u32.totalorder %s1845_s24, %s2429_s16 }
 0x562   :  { %p1851_p7 = pnand %p1849_p6, %p1846_p5 }
 0x564   :  { %1854 = shalt.err (!%p1851_p7)
}
 0x565   :  { %1397 = dma.vmem_to_hbm [thread:$0]  %s1395_s14, 32, %s2429_s16, [#allocation3]  }
 0x5ea   :  { %v1369_v43 = vpop.xlane.xlu1 %1368 }
 0x5eb   :  { %1831 = vlog2.f32 %v1369_v43 }
 0x5f5   :  { %v1832_v44 = vpop.eup %1831 }
 0x5f6   :  { %v1371_v45 = vmul.f32 0.6931472, %v1832_v44 }
 0x5f8   :  { %v1372_v46 = vsub.f32 %v1359_v34, %v1371_v45  ;;  %v1373_v47 = vsub.f32 %v1360_v24, %v1371_v45 }
 0x5fa   :  { %v1376_v48 = vcombine.low %v1372_v46, %v1373_v47 }
 0x5fc   :  { %1514 = vst.sshfl [vmem:[%s2428_s15] sm:$0x33 pattern:$0x76325410] %v1376_v48 }
 0x5fd   :  { %1855 = dma.done.wait [#allocation3], 32  }
 0x5fe   :  { %1856 = vsyncadd [#allocation3], 4294967264 }
 0x5ff   :  { %1407 = vsyncpa [#allocation3], 1 }

</bundles_post_ra>
